<compile_context>
chip_gen: v5e
topology: v5e:2x2
jax: 0.10.0
libtpu: 0.0.40
codegen_flags: <defaults>
</compile_context>

<pallas_src>
import jax
import jax.numpy as jnp
from jax import lax
from jax.experimental import pallas as pl
from jax.experimental.pallas import tpu as pltpu


# ---------------------------------------------------------------------------
# Hardware-aware VMEM budget / tiling helpers
# ---------------------------------------------------------------------------
def _vmem_limit_bytes():
    """Generation-aware scoped-VMEM limit: ~3/4 of physical VMEM, capped at
    96 MiB (-> 96 MiB on v5e/v6e's 128 MiB VMEM, 48 MiB on v7x's 64 MiB)."""
    cap = 64 * 1024 * 1024            # conservative fallback (v7x-sized)
    try:
        info = pltpu.get_tpu_info()
        cap = int(getattr(info, "vmem_capacity_bytes", 0) or cap)
    except Exception:
        pass
    return int(min(cap * 3 // 4, 96 * 1024 * 1024))


_VMEM_LIMIT = _vmem_limit_bytes()
# Leave headroom for Pallas-internal scratch, semaphores and the tiny param blocks.
_BLOCK_BUDGET = max(_VMEM_LIMIT - (8 << 20), 8 << 20)


def _round_up(x, m):
    return (x + m - 1) // m * m


def _choose_tile(m, per_lane_bytes, fixed_bytes=0, soft_cap_lanes=4096):
    """Pick a lane tile (multiple of 128) so that all pipelined blocks fit the
    VMEM budget.  Returns (tile, padded_m).  When the whole slab would fit in
    one block, it is still split in two so both v7x TensorCores get work
    (one extra ~0.35us step on single-TC v5e/v6e is noise)."""
    m128 = _round_up(max(m, 1), 128)
    avail = max(_BLOCK_BUDGET - fixed_bytes, per_lane_bytes * 128)
    tile = max(128, (avail // max(per_lane_bytes, 1)) // 128 * 128)
    tile = min(tile, soft_cap_lanes)
    if tile >= m128:
        tile = m128 if m128 < 256 else max(128, (m128 // 2) // 128 * 128)
    m_pad = _round_up(m128, tile)
    return tile, m_pad


def _pad_lanes(x, m_pad):
    m = x.shape[-1]
    return x if m == m_pad else jnp.pad(x, ((0, 0), (0, m_pad - m)))


def _cparams():
    return pltpu.CompilerParams(dimension_semantics=("parallel",),
                                vmem_limit_bytes=_VMEM_LIMIT)


# ---------------------------------------------------------------------------
# Pallas kernels
# ---------------------------------------------------------------------------
def _bias_sign_kernel(x_ref, b_ref, o_ref):
    """LearnableBias + BinaryActivation forward: sign(x + b).

    The STE expression in the PyTorch module (out_fwd.detach() - out3.detach()
    + out3) equals sign(x) in the forward pass, so the polynomial is dead work
    and is dropped.  Output is bf16: {-1, 0, +1} are exact."""
    y = x_ref[...] + b_ref[...]                       # (C, tm) + (C, 1) lane-broadcast
    one = jnp.ones_like(y)
    sgn = jnp.where(y > 0, one, jnp.where(y < 0, -one, jnp.zeros_like(y)))
    o_ref[...] = sgn.astype(o_ref.dtype)


def _conv_bn_res_prelu_kernel(w_ref, x_ref, res_ref, mean_ref, scale_ref,
                              beta_ref, b_pre_ref, slope_ref, b_post_ref,
                              o_ref):
    """Fused: conv-as-GEMM (bf16 MXU) -> BatchNorm(eval) -> +residual -> +bias
    -> PReLU -> +bias.  The BN/bias op order mirrors the reference exactly so
    the downstream sign() sees bit-identical inputs."""
    y = jnp.dot(w_ref[...], x_ref[...], preferred_element_type=jnp.float32)
    y = (y - mean_ref[...]) * scale_ref[...] + beta_ref[...]   # BN (eval)
    res = res_ref[...]
    if res.shape[0] != y.shape[0]:
        # Downsample branch: one (C, tm) residual broadcast over both output halves.
        res = jnp.concatenate([res] * (y.shape[0] // res.shape[0]), axis=0)
    y = y + res                                                # residual
    y = y + b_pre_ref[...]                                     # LearnableBias (move*2)
    y = jnp.where(y > 0, y, y * slope_ref[...])                # PReLU (per channel)
    y = y + b_post_ref[...]                                    # LearnableBias (move*3)
    o_ref[...] = y.astype(o_ref.dtype)


# ---------------------------------------------------------------------------
# pallas_call wrappers
# ---------------------------------------------------------------------------
def _bias_sign(x_cm, bias_c, out_dtype=jnp.bfloat16):
    """x_cm: (C, M); bias_c: (C,) -> sign(x + bias) as (C, M) in bf16."""
    c, m = x_cm.shape
    per_lane = 2 * c * (x_cm.dtype.itemsize + jnp.dtype(out_dtype).itemsize)
    tile, m_pad = _choose_tile(m, per_lane, fixed_bytes=4 * c * 4,
                               soft_cap_lanes=8192)
    xin = _pad_lanes(x_cm, m_pad)
    b = bias_c.reshape(c, 1).astype(x_cm.dtype)
    out = pl.pallas_call(
        _bias_sign_kernel,
        out_shape=jax.ShapeDtypeStruct((c, m_pad), out_dtype),
        grid=(m_pad // tile,),
        in_specs=[
            pl.BlockSpec((c, tile), lambda i: (0, i)),
            pl.BlockSpec((c, 1), lambda i: (0, 0)),
        ],
        out_specs=pl.BlockSpec((c, tile), lambda i: (0, i)),
        compiler_params=_cparams(),
    )(xin, b)
    return out if m == m_pad else out[:, :m]


def _conv_bn_res_prelu(w2d, x_km, res_cm, mean_c, scale_c, beta_c,
                       b_pre_c, slope_c, b_post_c, out_dtype):
    """w2d: (Co, K) 1/64-grid weights; x_km: (K, M) binarized bf16;
    res_cm: (Cr, M) f32 with Co % Cr == 0; per-channel params (Co,).
    Returns prelu(bn(w @ x) + res + b_pre) + b_post as (Co, M), fully fused."""
    co, k = w2d.shape
    k2, m = x_km.shape
    cr, mr = res_cm.shape
    assert k == k2 and m == mr and co % cr == 0
    f32 = jnp.float32
    col = lambda v: v.reshape(co, 1).astype(f32)
    w_bf = w2d.astype(jnp.bfloat16)           # 1/64-grid, |w|<=0.5: exact in bf16
    out_isz = jnp.dtype(out_dtype).itemsize
    # Double-buffered streamed blocks (X, residual, output).  The weight block's
    # index never changes so it is DMA'd once, but the pipeline still allocates
    # it twice -- count that in the budget.
    # TODO(synk): pin the weight single-buffered (pl.Buffered(1) / VMEM scratch)
    # to reclaim that headroom at very large channel counts.
    per_lane = 2 * (k * x_km.dtype.itemsize + cr * res_cm.dtype.itemsize
                    + co * out_isz)
    fixed = 2 * co * k * 2 + 16 * co * 4
    tile, m_pad = _choose_tile(m, per_lane, fixed_bytes=fixed, soft_cap_lanes=4096)
    x_p = _pad_lanes(x_km, m_pad)
    r_p = _pad_lanes(res_cm, m_pad)
    out = pl.pallas_call(
        _conv_bn_res_prelu_kernel,
        out_shape=jax.ShapeDtypeStruct((co, m_pad), out_dtype),
        grid=(m_pad // tile,),
        in_specs=[
            pl.BlockSpec((co, k), lambda i: (0, 0)),
            pl.BlockSpec((k, tile), lambda i: (0, i)),
            pl.BlockSpec((cr, tile), lambda i: (0, i)),
            pl.BlockSpec((co, 1), lambda i: (0, 0)),
            pl.BlockSpec((co, 1), lambda i: (0, 0)),
            pl.BlockSpec((co, 1), lambda i: (0, 0)),
            pl.BlockSpec((co, 1), lambda i: (0, 0)),
            pl.BlockSpec((co, 1), lambda i: (0, 0)),
            pl.BlockSpec((co, 1), lambda i: (0, 0)),
        ],
        out_specs=pl.BlockSpec((co, tile), lambda i: (0, i)),
        compiler_params=_cparams(),
    )(w_bf, x_p, r_p, col(mean_c), col(scale_c), col(beta_c),
      col(b_pre_c), col(slope_c), col(b_post_c))
    return out if m == m_pad else out[:, :m]


# ---------------------------------------------------------------------------
# Wrapper-side layout helpers (no extra transposes vs. previous revision)
# ---------------------------------------------------------------------------
def _im2col_3x3_cnhw(y_cnhw, stride):
    # TODO(synk): the 3x3-tap expansion is still a wrapper-side (9C, M) bf16
    # materialization; moving the 9-tap accumulation in-kernel (shifted reads of
    # a spatially padded slab) would remove this last large intermediate.
    c, n, h, w = y_cnhw.shape
    ho = (h + 2 - 3) // stride + 1
    wo = (w + 2 - 3) // stride + 1
    yp = jnp.pad(y_cnhw, ((0, 0), (0, 0), (1, 1), (1, 1)))
    cols = []
    for kh in range(3):
        for kw in range(3):
            cols.append(yp[:, :, kh::stride, kw::stride][:, :, :ho, :wo])
    patches = jnp.stack(cols, axis=1)                 # (C, 9, N, Ho, Wo), tap = kh*3+kw
    return patches.reshape(c * 9, n * ho * wo), ho, wo


# ---------------------------------------------------------------------------
# BasicBlock forward (Pallas) and pure-JAX reference
# ---------------------------------------------------------------------------
def basic_block_forward(x, params, *, stride=1):
    """ReActNet BasicBlock forward (inference).  x: (N, C, H, W)."""
    n, c, h, w = x.shape
    eps = 1e-5

    def bn_p(p):
        return p["mean"], p["gamma"] / jnp.sqrt(p["var"] + eps), p["beta"]

    xc = x.transpose(1, 0, 2, 3)                      # (C, N, H, W): channel-on-sublane

    # move11 + BinaryActivation (fused: sign(x + b11)), emitted in bf16.
    b1 = _bias_sign(xc.reshape(c, n * h * w), params["b11"])

    # binary 3x3 conv -> bn1 -> +residual -> move12 -> prelu1 -> move13 (fused)
    patches, ho, wo = _im2col_3x3_cnhw(b1.reshape(c, n, h, w), stride)
    if stride == 2:
        # TODO(synk): AvgPool2d(2,2) residual pooling stays as an XLA reshape-mean.
        xr = xc.reshape(c, n, h // 2, 2, w // 2, 2).mean(axis=(3, 5))
    else:
        xr = xc
    res1 = xr.reshape(c, n * ho * wo)
    m1, s1, g1 = bn_p(params["bn1"])
    out1 = _conv_bn_res_prelu(
        params["w3x3"].reshape(c, c * 9), patches, res1, m1, s1, g1,
        params["b12"], params["prelu1"], params["b13"], x.dtype)

    # move21 + BinaryActivation
    b2 = _bias_sign(out1, params["b21"])

    # binary pointwise conv(s) -> bn2 -> +out1 -> move22 -> prelu2 -> move23 (fused)
    if "w_pw" in params:                      # inplanes == planes
        m2, s2, g2 = bn_p(params["bn2"])
        out2 = _conv_bn_res_prelu(
            params["w_pw"].reshape(-1, c), b2, out1, m2, s2, g2,
            params["b22"], params["prelu2"], params["b23"], x.dtype)
    else:                                     # planes == 2 * inplanes (downsample)
        # Single stacked (2C, C) GEMM: b2/out1 streamed once, residual broadcast
        # over both halves inside the kernel, no output concat copy.
        m21, s21, g21 = bn_p(params["bn2_1"])
        m22, s22, g22 = bn_p(params["bn2_2"])
        w_pw = jnp.concatenate([params["w_pw_down1"].reshape(c, c),
                                params["w_pw_down2"].reshape(c, c)], axis=0)
        cat = lambda a, b: jnp.concatenate([a, b], axis=0)
        out2 = _conv_bn_res_prelu(
            w_pw, b2, out1, cat(m21, m22), cat(s21, s22), cat(g21, g22),
            params["b22"], params["prelu2"], params["b23"], x.dtype)

    return out2.reshape(-1, n, ho, wo).transpose(1, 0, 2, 3)


def basic_block_reference(x, params, *, stride=1):
    """Pure-JAX mirror of the PyTorch BasicBlock.forward (BatchNorm in eval mode)."""
    f32 = jnp.float32

    def lbias(t, b):
        return t + b.reshape(1, -1, 1, 1)

    def binact(t):  # faithful mirror of the STE expression (detach is a no-op in fwd)
        out_forward = jnp.sign(t)
        mask1 = (t < -1.0).astype(f32)
        mask2 = (t < 0.0).astype(f32)
        mask3 = (t < 1.0).astype(f32)
        out1 = -1.0 * mask1 + (t * t + 2.0 * t) * (1.0 - mask1)
        out2 = out1 * mask2 + (-t * t + 2.0 * t) * (1.0 - mask2)
        out3 = out2 * mask3 + 1.0 * (1.0 - mask3)
        return out_forward - out3 + out3

    def conv(t, wgt, s, pad):
        return lax.conv_general_dilated(
            t, wgt, window_strides=(s, s), padding=((pad, pad), (pad, pad)),
            dimension_numbers=("NCHW", "OIHW", "NCHW"),
            precision=lax.Precision.HIGHEST)

    def bn(t, p, eps=1e-5):
        inv = p["gamma"] / jnp.sqrt(p["var"] + eps)
        return (t - p["mean"].reshape(1, -1, 1, 1)) * inv.reshape(1, -1, 1, 1) \
            + p["beta"].reshape(1, -1, 1, 1)

    def prelu(t, a):
        return jnp.where(t > 0, t, a.reshape(1, -1, 1, 1) * t)

    out1 = binact(lbias(x, params["b11"]))
    out1 = bn(conv(out1, params["w3x3"], stride, 1), params["bn1"])
    if stride == 2:
        n, c, h, w = x.shape
        xr = x.reshape(n, c, h // 2, 2, w // 2, 2).mean(axis=(3, 5))
    else:
        xr = x
    out1 = xr + out1
    out1 = lbias(prelu(lbias(out1, params["b12"]), params["prelu1"]), params["b13"])

    out2 = binact(lbias(out1, params["b21"]))
    if "w_pw" in params:
        out2 = bn(conv(out2, params["w_pw"], 1, 0), params["bn2"])
        out2 = out2 + out1
    else:
        o_a = bn(conv(out2, params["w_pw_down1"], 1, 0), params["bn2_1"]) + out1
        o_b = bn(conv(out2, params["w_pw_down2"], 1, 0), params["bn2_2"]) + out1
        out2 = jnp.concatenate([o_a, o_b], axis=1)
    out2 = lbias(prelu(lbias(out2, params["b22"]), params["prelu2"]), params["b23"])
    return out2


# ---------------------------------------------------------------------------
# Parameter construction (deterministic, small)
# ---------------------------------------------------------------------------
def init_basic_block_params(key, inplanes, planes):
    assert planes in (inplanes, 2 * inplanes)
    keys = iter(jax.random.split(key, 24))
    f32 = jnp.float32

    def qweight(k, shape):
        # Conv weights quantized to multiples of 1/64 (|w| <= 0.5): exactly
        # representable in bf16 AND every conv reduction is exact in f32, so the
        # Pallas bf16 MXU GEMM and the XLA f32 conv reference agree to the ulp.
        return jax.random.randint(k, shape, -32, 33).astype(f32) / 64.0

    def vec(k, num, scale=0.2):
        return jax.random.normal(k, (num,), f32) * scale

    def bn(k, c):
        k1, k2, k3, k4 = jax.random.split(k, 4)
        return {"gamma": 1.0 + 0.1 * jax.random.normal(k1, (c,), f32),
                "beta": 0.1 * jax.random.normal(k2, (c,), f32),
                "mean": 0.1 * jax.random.normal(k3, (c,), f32),
                "var": 0.5 + jax.random.uniform(k4, (c,), f32)}

    q64 = lambda v: jnp.round(v * 64.0) / 64.0   # keep b11 on the same 1/64 grid as x
    p = {
        "b11": q64(vec(next(keys), inplanes)),
        "b12": vec(next(keys), inplanes),
        "b13": vec(next(keys), inplanes),
        "b21": vec(next(keys), inplanes),
        "b22": vec(next(keys), planes),
        "b23": vec(next(keys), planes),
        "prelu1": 0.25 + vec(next(keys), inplanes, 0.05),
        "prelu2": 0.25 + vec(next(keys), planes, 0.05),
        "w3x3": qweight(next(keys), (inplanes, inplanes, 3, 3)),
        "bn1": bn(next(keys), inplanes),
    }
    if planes == inplanes:
        p["w_pw"] = qweight(next(keys), (planes, inplanes, 1, 1))
        p["bn2"] = bn(next(keys), planes)
    else:
        p["w_pw_down1"] = qweight(next(keys), (inplanes, inplanes, 1, 1))
        p["w_pw_down2"] = qweight(next(keys), (inplanes, inplanes, 1, 1))
        p["bn2_1"] = bn(next(keys), inplanes)
        p["bn2_2"] = bn(next(keys), inplanes)
    return p


if __name__ == "__main__":
    # TODO(synk): BatchNorm runs in eval mode (running stats); training-mode
    # batch statistics and the STE backward (custom_vjp) are not implemented.
    key = jax.random.PRNGKey(0)
    kx1, kp1, kx2, kp2 = jax.random.split(key, 4)

    fwd = jax.jit(basic_block_forward, static_argnames=("stride",))
    ref_fn = jax.jit(basic_block_reference, static_argnames=("stride",))

    # Inputs quantized to multiples of 1/64 so the reference's STE expression
    # cancels exactly to sign(.) at the binarization discontinuity.
    n, c, h, w = 2, 8, 16, 16

    # Config 1: inplanes == planes, stride 1 (identity residual path).
    x1 = jnp.round(jax.random.normal(kx1, (n, c, h, w), jnp.float32) * 64.0) / 64.0
    p1 = init_basic_block_params(kp1, inplanes=c, planes=c)
    out1 = jax.block_until_ready(fwd(x1, p1, stride=1))
    ref1 = ref_fn(x1, p1, stride=1)
    assert out1.shape == ref1.shape and out1.dtype == ref1.dtype
    assert bool(jnp.allclose(out1, ref1, rtol=1e-4, atol=1e-4)), "mismatch (equal-planes path)"

    # Config 2: planes == 2*inplanes, stride 2 (avg-pool residual + stacked pw conv).
    x2 = jnp.round(jax.random.normal(kx2, (n, c, h, w), jnp.float32) * 64.0) / 64.0
    p2 = init_basic_block_params(kp2, inplanes=c, planes=2 * c)
    out2 = jax.block_until_ready(fwd(x2, p2, stride=2))
    ref2 = ref_fn(x2, p2, stride=2)
    assert out2.shape == ref2.shape and out2.dtype == ref2.dtype
    assert bool(jnp.allclose(out2, ref2, rtol=1e-4, atol=1e-4)), "mismatch (downsample path)"

    print("KERNEL_OK")
</pallas_src>

<mosaic_0001>
module attributes {stable_mosaic.version = 11 : i64} {
  func.func @_bias_sign_kernel(%arg0: i32, %arg1: memref<8x256xf32, #tpu.memory_space<vmem>>, %arg2: memref<8x1xf32, #tpu.memory_space<vmem>>, %arg3: memref<8x256xbf16, #tpu.memory_space<vmem>>) attributes {dimension_semantics = [#tpu.dimension_semantics<parallel>], iteration_bounds = array<i64: 2>, scalar_prefetch = 0 : i64, scratch_operands = 0 : i64, tpu.core_type = #tpu.core_type<tc>, window_params = [{transform_indices = @transform_0, window_bounds = array<i64: 8, 256>}, {pipeline_mode = #tpu.pipeline_mode<synchronous>, transform_indices = @transform_1, window_bounds = array<i64: 8, 1>}, {transform_indices = @transform_2, window_bounds = array<i64: 8, 256>}]} {
    %c0 = arith.constant 0 : index
    %c0_0 = arith.constant 0 : index
    %0 = vector.load %arg1[%c0, %c0_0] : memref<8x256xf32, #tpu.memory_space<vmem>>, vector<8x256xf32>
    %c0_1 = arith.constant 0 : index
    %c0_2 = arith.constant 0 : index
    %1 = vector.load %arg2[%c0_1, %c0_2] : memref<8x1xf32, #tpu.memory_space<vmem>>, vector<8x1xf32>
    %2 = vector.broadcast %1 : vector<8x1xf32> to vector<8x256xf32>
    %3 = arith.addf %0, %2 : vector<8x256xf32>
    %cst = arith.constant 1.000000e+00 : f32
    %4 = vector.broadcast %cst : f32 to vector<8x256xf32>
    %cst_3 = arith.constant 0.000000e+00 : f32
    %5 = vector.broadcast %cst_3 : f32 to vector<8x256xf32>
    %6 = arith.cmpf ogt, %3, %5 : vector<8x256xf32>
    %cst_4 = arith.constant 0.000000e+00 : f32
    %7 = vector.broadcast %cst_4 : f32 to vector<8x256xf32>
    %8 = arith.cmpf olt, %3, %7 : vector<8x256xf32>
    %cst_5 = arith.constant 0.000000e+00 : f32
    %9 = vector.broadcast %cst_5 : f32 to vector<8x256xf32>
    %10 = arith.subf %9, %4 : vector<8x256xf32>
    %cst_6 = arith.constant 0.000000e+00 : f32
    %11 = vector.broadcast %cst_6 : f32 to vector<8x256xf32>
    %12 = arith.select %8, %10, %11 : vector<8x256xi1>, vector<8x256xf32>
    %13 = arith.select %6, %4, %12 : vector<8x256xi1>, vector<8x256xf32>
    %14 = arith.truncf %13 : vector<8x256xf32> to vector<8x256xbf16>
    %c0_7 = arith.constant 0 : index
    %c0_8 = arith.constant 0 : index
    %15 = vector.load %arg3[%c0_7, %c0_8] : memref<8x256xbf16, #tpu.memory_space<vmem>>, vector<8x256xbf16>
    tpu.vector_store %arg3[%c0_7, %c0_8], %14 {strides = array<i32>} : memref<8x256xbf16, #tpu.memory_space<vmem>>, vector<8x256xbf16>,
    return
  }
  func.func @transform_0(%arg0: i32) -> (i32, i32) {
    %c0_i32 = arith.constant 0 : i32
    %c0_i32_0 = arith.constant 0 : i32
    return %c0_i32, %arg0 : i32, i32
  }
  func.func @transform_1(%arg0: i32) -> (i32, i32) {
    %c0_i32 = arith.constant 0 : i32
    %c0_i32_0 = arith.constant 0 : i32
    %c0_i32_1 = arith.constant 0 : i32
    return %c0_i32, %c0_i32_0 : i32, i32
  }
  func.func @transform_2(%arg0: i32) -> (i32, i32) {
    %c0_i32 = arith.constant 0 : i32
    %c0_i32_0 = arith.constant 0 : i32
    return %c0_i32, %arg0 : i32, i32
  }
}

module attributes {stable_mosaic.version = 11 : i64} {
  func.func @_conv_bn_res_prelu_kernel(%arg0: i32, %arg1: memref<8x8xbf16, #tpu.memory_space<vmem>>, %arg2: memref<8x256xbf16, #tpu.memory_space<vmem>>, %arg3: memref<8x256xf32, #tpu.memory_space<vmem>>, %arg4: memref<8x1xf32, #tpu.memory_space<vmem>>, %arg5: memref<8x1xf32, #tpu.memory_space<vmem>>, %arg6: memref<8x1xf32, #tpu.memory_space<vmem>>, %arg7: memref<8x1xf32, #tpu.memory_space<vmem>>, %arg8: memref<8x1xf32, #tpu.memory_space<vmem>>, %arg9: memref<8x1xf32, #tpu.memory_space<vmem>>, %arg10: memref<8x256xf32, #tpu.memory_space<vmem>>) attributes {dimension_semantics = [#tpu.dimension_semantics<parallel>], iteration_bounds = array<i64: 2>, scalar_prefetch = 0 : i64, scratch_operands = 0 : i64, tpu.core_type = #tpu.core_type<tc>, window_params = [{pipeline_mode = #tpu.pipeline_mode<synchronous>, transform_indices = @transform_0, window_bounds = array<i64: 8, 8>}, {transform_indices = @transform_1, window_bounds = array<i64: 8, 256>}, {transform_indices = @transform_2, window_bounds = array<i64: 8, 256>}, {pipeline_mode = #tpu.pipeline_mode<synchronous>, transform_indices = @transform_3, window_bounds = array<i64: 8, 1>}, {pipeline_mode = #tpu.pipeline_mode<synchronous>, transform_indices = @transform_4, window_bounds = array<i64: 8, 1>}, {pipeline_mode = #tpu.pipeline_mode<synchronous>, transform_indices = @transform_5, window_bounds = array<i64: 8, 1>}, {pipeline_mode = #tpu.pipeline_mode<synchronous>, transform_indices = @transform_6, window_bounds = array<i64: 8, 1>}, {pipeline_mode = #tpu.pipeline_mode<synchronous>, transform_indices = @transform_7, window_bounds = array<i64: 8, 1>}, {pipeline_mode = #tpu.pipeline_mode<synchronous>, transform_indices = @transform_8, window_bounds = array<i64: 8, 1>}, {transform_indices = @transform_9, window_bounds = array<i64: 8, 256>}]} {
    %c0 = arith.constant 0 : index
    %c0_0 = arith.constant 0 : index
    %0 = vector.load %arg1[%c0, %c0_0] : memref<8x8xbf16, #tpu.memory_space<vmem>>, vector<8x8xbf16>
    %c0_1 = arith.constant 0 : index
    %c0_2 = arith.constant 0 : index
    %1 = vector.load %arg2[%c0_1, %c0_2] : memref<8x256xbf16, #tpu.memory_space<vmem>>, vector<8x256xbf16>
    %cst = arith.constant dense<0.000000e+00> : vector<8x256xf32>
    %2 = tpu.matmul %0, %1, %cst {dimension_numbers = #tpu.dot_dimension_numbers<[1], [0], [0], [1], [0, 0, 1, 1], [], []>} : vector<8x8xbf16>, vector<8x256xbf16>, vector<8x256xf32> -> vector<8x256xf32>
    %c0_3 = arith.constant 0 : index
    %c0_4 = arith.constant 0 : index
    %3 = vector.load %arg4[%c0_3, %c0_4] : memref<8x1xf32, #tpu.memory_space<vmem>>, vector<8x1xf32>
    %4 = vector.broadcast %3 : vector<8x1xf32> to vector<8x256xf32>
    %5 = arith.subf %2, %4 : vector<8x256xf32>
    %c0_5 = arith.constant 0 : index
    %c0_6 = arith.constant 0 : index
    %6 = vector.load %arg5[%c0_5, %c0_6] : memref<8x1xf32, #tpu.memory_space<vmem>>, vector<8x1xf32>
    %7 = vector.broadcast %6 : vector<8x1xf32> to vector<8x256xf32>
    %8 = arith.mulf %5, %7 : vector<8x256xf32>
    %c0_7 = arith.constant 0 : index
    %c0_8 = arith.constant 0 : index
    %9 = vector.load %arg6[%c0_7, %c0_8] : memref<8x1xf32, #tpu.memory_space<vmem>>, vector<8x1xf32>
    %10 = vector.broadcast %9 : vector<8x1xf32> to vector<8x256xf32>
    %11 = arith.addf %8, %10 : vector<8x256xf32>
    %c0_9 = arith.constant 0 : index
    %c0_10 = arith.constant 0 : index
    %12 = vector.load %arg3[%c0_9, %c0_10] : memref<8x256xf32, #tpu.memory_space<vmem>>, vector<8x256xf32>
    %13 = arith.addf %11, %12 : vector<8x256xf32>
    %c0_11 = arith.constant 0 : index
    %c0_12 = arith.constant 0 : index
    %14 = vector.load %arg7[%c0_11, %c0_12] : memref<8x1xf32, #tpu.memory_space<vmem>>, vector<8x1xf32>
    %15 = vector.broadcast %14 : vector<8x1xf32> to vector<8x256xf32>
    %16 = arith.addf %13, %15 : vector<8x256xf32>
    %cst_13 = arith.constant 0.000000e+00 : f32
    %17 = vector.broadcast %cst_13 : f32 to vector<8x256xf32>
    %18 = arith.cmpf ogt, %16, %17 : vector<8x256xf32>
    %c0_14 = arith.constant 0 : index
    %c0_15 = arith.constant 0 : index
    %19 = vector.load %arg8[%c0_14, %c0_15] : memref<8x1xf32, #tpu.memory_space<vmem>>, vector<8x1xf32>
    %20 = vector.broadcast %19 : vector<8x1xf32> to vector<8x256xf32>
    %21 = arith.mulf %16, %20 : vector<8x256xf32>
    %22 = arith.select %18, %16, %21 : vector<8x256xi1>, vector<8x256xf32>
    %c0_16 = arith.constant 0 : index
    %c0_17 = arith.constant 0 : index
    %23 = vector.load %arg9[%c0_16, %c0_17] : memref<8x1xf32, #tpu.memory_space<vmem>>, vector<8x1xf32>
    %24 = vector.broadcast %23 : vector<8x1xf32> to vector<8x256xf32>
    %25 = arith.addf %22, %24 : vector<8x256xf32>
    %c0_18 = arith.constant 0 : index
    %c0_19 = arith.constant 0 : index
    %26 = vector.load %arg10[%c0_18, %c0_19] : memref<8x256xf32, #tpu.memory_space<vmem>>, vector<8x256xf32>
    tpu.vector_store %arg10[%c0_18, %c0_19], %25 {strides = array<i32>} : memref<8x256xf32, #tpu.memory_space<vmem>>, vector<8x256xf32>,
    return
  }
  func.func @transform_0(%arg0: i32) -> (i32, i32) {
    %c0_i32 = arith.constant 0 : i32
    %c0_i32_0 = arith.constant 0 : i32
    %c0_i32_1 = arith.constant 0 : i32
    return %c0_i32, %c0_i32_0 : i32, i32
  }
  func.func @transform_1(%arg0: i32) -> (i32, i32) {
    %c0_i32 = arith.constant 0 : i32
    %c0_i32_0 = arith.constant 0 : i32
    return %c0_i32, %arg0 : i32, i32
  }
  func.func @transform_2(%arg0: i32) -> (i32, i32) {
    %c0_i32 = arith.constant 0 : i32
    %c0_i32_0 = arith.constant 0 : i32
    return %c0_i32, %arg0 : i32, i32
  }
  func.func @transform_3(%arg0: i32) -> (i32, i32) {
    %c0_i32 = arith.constant 0 : i32
    %c0_i32_0 = arith.constant 0 : i32
    %c0_i32_1 = arith.constant 0 : i32
    return %c0_i32, %c0_i32_0 : i32, i32
  }
  func.func @transform_4(%arg0: i32) -> (i32, i32) {
    %c0_i32 = arith.constant 0 : i32
    %c0_i32_0 = arith.constant 0 : i32
    %c0_i32_1 = arith.constant 0 : i32
    return %c0_i32, %c0_i32_0 : i32, i32
  }
  func.func @transform_5(%arg0: i32) -> (i32, i32) {
    %c0_i32 = arith.constant 0 : i32
    %c0_i32_0 = arith.constant 0 : i32
    %c0_i32_1 = arith.constant 0 : i32
    return %c0_i32, %c0_i32_0 : i32, i32
  }
  func.func @transform_6(%arg0: i32) -> (i32, i32) {
    %c0_i32 = arith.constant 0 : i32
    %c0_i32_0 = arith.constant 0 : i32
    %c0_i32_1 = arith.constant 0 : i32
    return %c0_i32, %c0_i32_0 : i32, i32
  }
  func.func @transform_7(%arg0: i32) -> (i32, i32) {
    %c0_i32 = arith.constant 0 : i32
    %c0_i32_0 = arith.constant 0 : i32
    %c0_i32_1 = arith.constant 0 : i32
    return %c0_i32, %c0_i32_0 : i32, i32
  }
  func.func @transform_8(%arg0: i32) -> (i32, i32) {
    %c0_i32 = arith.constant 0 : i32
    %c0_i32_0 = arith.constant 0 : i32
    %c0_i32_1 = arith.constant 0 : i32
    return %c0_i32, %c0_i32_0 : i32, i32
  }
  func.func @transform_9(%arg0: i32) -> (i32, i32) {
    %c0_i32 = arith.constant 0 : i32
    %c0_i32_0 = arith.constant 0 : i32
    return %c0_i32, %arg0 : i32, i32
  }
}

module attributes {stable_mosaic.version = 11 : i64} {
  func.func @_conv_bn_res_prelu_kernel(%arg0: i32, %arg1: memref<8x72xbf16, #tpu.memory_space<vmem>>, %arg2: memref<72x256xbf16, #tpu.memory_space<vmem>>, %arg3: memref<8x256xf32, #tpu.memory_space<vmem>>, %arg4: memref<8x1xf32, #tpu.memory_space<vmem>>, %arg5: memref<8x1xf32, #tpu.memory_space<vmem>>, %arg6: memref<8x1xf32, #tpu.memory_space<vmem>>, %arg7: memref<8x1xf32, #tpu.memory_space<vmem>>, %arg8: memref<8x1xf32, #tpu.memory_space<vmem>>, %arg9: memref<8x1xf32, #tpu.memory_space<vmem>>, %arg10: memref<8x256xf32, #tpu.memory_space<vmem>>) attributes {dimension_semantics = [#tpu.dimension_semantics<parallel>], iteration_bounds = array<i64: 2>, scalar_prefetch = 0 : i64, scratch_operands = 0 : i64, tpu.core_type = #tpu.core_type<tc>, window_params = [{pipeline_mode = #tpu.pipeline_mode<synchronous>, transform_indices = @transform_0, window_bounds = array<i64: 8, 72>}, {transform_indices = @transform_1, window_bounds = array<i64: 72, 256>}, {transform_indices = @transform_2, window_bounds = array<i64: 8, 256>}, {pipeline_mode = #tpu.pipeline_mode<synchronous>, transform_indices = @transform_3, window_bounds = array<i64: 8, 1>}, {pipeline_mode = #tpu.pipeline_mode<synchronous>, transform_indices = @transform_4, window_bounds = array<i64: 8, 1>}, {pipeline_mode = #tpu.pipeline_mode<synchronous>, transform_indices = @transform_5, window_bounds = array<i64: 8, 1>}, {pipeline_mode = #tpu.pipeline_mode<synchronous>, transform_indices = @transform_6, window_bounds = array<i64: 8, 1>}, {pipeline_mode = #tpu.pipeline_mode<synchronous>, transform_indices = @transform_7, window_bounds = array<i64: 8, 1>}, {pipeline_mode = #tpu.pipeline_mode<synchronous>, transform_indices = @transform_8, window_bounds = array<i64: 8, 1>}, {transform_indices = @transform_9, window_bounds = array<i64: 8, 256>}]} {
    %c0 = arith.constant 0 : index
    %c0_0 = arith.constant 0 : index
    %0 = vector.load %arg1[%c0, %c0_0] : memref<8x72xbf16, #tpu.memory_space<vmem>>, vector<8x72xbf16>
    %c0_1 = arith.constant 0 : index
    %c0_2 = arith.constant 0 : index
    %1 = vector.load %arg2[%c0_1, %c0_2] : memref<72x256xbf16, #tpu.memory_space<vmem>>, vector<72x256xbf16>
    %cst = arith.constant dense<0.000000e+00> : vector<8x256xf32>
    %2 = tpu.matmul %0, %1, %cst {dimension_numbers = #tpu.dot_dimension_numbers<[1], [0], [0], [1], [0, 0, 1, 1], [], []>} : vector<8x72xbf16>, vector<72x256xbf16>, vector<8x256xf32> -> vector<8x256xf32>
    %c0_3 = arith.constant 0 : index
    %c0_4 = arith.constant 0 : index
    %3 = vector.load %arg4[%c0_3, %c0_4] : memref<8x1xf32, #tpu.memory_space<vmem>>, vector<8x1xf32>
    %4 = vector.broadcast %3 : vector<8x1xf32> to vector<8x256xf32>
    %5 = arith.subf %2, %4 : vector<8x256xf32>
    %c0_5 = arith.constant 0 : index
    %c0_6 = arith.constant 0 : index
    %6 = vector.load %arg5[%c0_5, %c0_6] : memref<8x1xf32, #tpu.memory_space<vmem>>, vector<8x1xf32>
    %7 = vector.broadcast %6 : vector<8x1xf32> to vector<8x256xf32>
    %8 = arith.mulf %5, %7 : vector<8x256xf32>
    %c0_7 = arith.constant 0 : index
    %c0_8 = arith.constant 0 : index
    %9 = vector.load %arg6[%c0_7, %c0_8] : memref<8x1xf32, #tpu.memory_space<vmem>>, vector<8x1xf32>
    %10 = vector.broadcast %9 : vector<8x1xf32> to vector<8x256xf32>
    %11 = arith.addf %8, %10 : vector<8x256xf32>
    %c0_9 = arith.constant 0 : index
    %c0_10 = arith.constant 0 : index
    %12 = vector.load %arg3[%c0_9, %c0_10] : memref<8x256xf32, #tpu.memory_space<vmem>>, vector<8x256xf32>
    %13 = arith.addf %11, %12 : vector<8x256xf32>
    %c0_11 = arith.constant 0 : index
    %c0_12 = arith.constant 0 : index
    %14 = vector.load %arg7[%c0_11, %c0_12] : memref<8x1xf32, #tpu.memory_space<vmem>>, vector<8x1xf32>
    %15 = vector.broadcast %14 : vector<8x1xf32> to vector<8x256xf32>
    %16 = arith.addf %13, %15 : vector<8x256xf32>
    %cst_13 = arith.constant 0.000000e+00 : f32
    %17 = vector.broadcast %cst_13 : f32 to vector<8x256xf32>
    %18 = arith.cmpf ogt, %16, %17 : vector<8x256xf32>
    %c0_14 = arith.constant 0 : index
    %c0_15 = arith.constant 0 : index
    %19 = vector.load %arg8[%c0_14, %c0_15] : memref<8x1xf32, #tpu.memory_space<vmem>>, vector<8x1xf32>
    %20 = vector.broadcast %19 : vector<8x1xf32> to vector<8x256xf32>
    %21 = arith.mulf %16, %20 : vector<8x256xf32>
    %22 = arith.select %18, %16, %21 : vector<8x256xi1>, vector<8x256xf32>
    %c0_16 = arith.constant 0 : index
    %c0_17 = arith.constant 0 : index
    %23 = vector.load %arg9[%c0_16, %c0_17] : memref<8x1xf32, #tpu.memory_space<vmem>>, vector<8x1xf32>
    %24 = vector.broadcast %23 : vector<8x1xf32> to vector<8x256xf32>
    %25 = arith.addf %22, %24 : vector<8x256xf32>
    %c0_18 = arith.constant 0 : index
    %c0_19 = arith.constant 0 : index
    %26 = vector.load %arg10[%c0_18, %c0_19] : memref<8x256xf32, #tpu.memory_space<vmem>>, vector<8x256xf32>
    tpu.vector_store %arg10[%c0_18, %c0_19], %25 {strides = array<i32>} : memref<8x256xf32, #tpu.memory_space<vmem>>, vector<8x256xf32>,
    return
  }
  func.func @transform_0(%arg0: i32) -> (i32, i32) {
    %c0_i32 = arith.constant 0 : i32
    %c0_i32_0 = arith.constant 0 : i32
    %c0_i32_1 = arith.constant 0 : i32
    return %c0_i32, %c0_i32_0 : i32, i32
  }
  func.func @transform_1(%arg0: i32) -> (i32, i32) {
    %c0_i32 = arith.constant 0 : i32
    %c0_i32_0 = arith.constant 0 : i32
    return %c0_i32, %arg0 : i32, i32
  }
  func.func @transform_2(%arg0: i32) -> (i32, i32) {
    %c0_i32 = arith.constant 0 : i32
    %c0_i32_0 = arith.constant 0 : i32
    return %c0_i32, %arg0 : i32, i32
  }
  func.func @transform_3(%arg0: i32) -> (i32, i32) {
    %c0_i32 = arith.constant 0 : i32
    %c0_i32_0 = arith.constant 0 : i32
    %c0_i32_1 = arith.constant 0 : i32
    return %c0_i32, %c0_i32_0 : i32, i32
  }
  func.func @transform_4(%arg0: i32) -> (i32, i32) {
    %c0_i32 = arith.constant 0 : i32
    %c0_i32_0 = arith.constant 0 : i32
    %c0_i32_1 = arith.constant 0 : i32
    return %c0_i32, %c0_i32_0 : i32, i32
  }
  func.func @transform_5(%arg0: i32) -> (i32, i32) {
    %c0_i32 = arith.constant 0 : i32
    %c0_i32_0 = arith.constant 0 : i32
    %c0_i32_1 = arith.constant 0 : i32
    return %c0_i32, %c0_i32_0 : i32, i32
  }
  func.func @transform_6(%arg0: i32) -> (i32, i32) {
    %c0_i32 = arith.constant 0 : i32
    %c0_i32_0 = arith.constant 0 : i32
    %c0_i32_1 = arith.constant 0 : i32
    return %c0_i32, %c0_i32_0 : i32, i32
  }
  func.func @transform_7(%arg0: i32) -> (i32, i32) {
    %c0_i32 = arith.constant 0 : i32
    %c0_i32_0 = arith.constant 0 : i32
    %c0_i32_1 = arith.constant 0 : i32
    return %c0_i32, %c0_i32_0 : i32, i32
  }
  func.func @transform_8(%arg0: i32) -> (i32, i32) {
    %c0_i32 = arith.constant 0 : i32
    %c0_i32_0 = arith.constant 0 : i32
    %c0_i32_1 = arith.constant 0 : i32
    return %c0_i32, %c0_i32_0 : i32, i32
  }
  func.func @transform_9(%arg0: i32) -> (i32, i32) {
    %c0_i32 = arith.constant 0 : i32
    %c0_i32_0 = arith.constant 0 : i32
    return %c0_i32, %arg0 : i32, i32
  }
}

</mosaic_0001>

<bundles_post_ra>
// kernel: basic_block_forward.4
= control target key start
LH: loop header
LB: loop body
LE: loop exit
PB: predicated region body
PF: predicated region fallthrough
CT: control target
= control target key end

     0   :  { %s270_s9 = smov 0   ;;  %s290_s0 = inlined_call_operand.vmem [shape: f32[8,512], index: 0, kind: input, shape index: {}]   ;;  %s291_s1 = inlined_call_operand.vmem [shape: f32[8,1], index: 1, kind: input, shape index: {}]   ;;  %s292_s2 = inlined_call_operand.vmem [shape: bf16[8,512], index: 2, kind: output, shape index: {}]  }
   0x1 LB: > { %s223_s10 = sadd.s32 4294967295, %s251_s9   ;;  %p227_p0 = scmp.ge.s32.totalorder %s251_s9, 1  ;;  %s251_s9 = sphi %s270_s9, %s12_s9  }
   0x2   : > { %p113_p1 = scmp.lt.s32.totalorder %s251_s9, 3 }
   0x4   : > { %p114_p2 = pnand %p227_p0, %p113_p1 }
   0x5   : > { %s228_s13 = sshll.u32 (!%p114_p2), %s223_s10, 1 }
   0x6   : > { %117 = sbr.rel (%p114_p2) target bundleno = 136 (0x88), region = 28  ;;  %p136_p3 = scmp.lt.s32.totalorder (!%p114_p2), %s228_s13, 3 }
   0xb   : > { %v149_v0 = vld [vmem:[%s291_s1] sm:$0xff]  ;;  %v253_v1 = vmov 0   ;;  %s294_s13 = smov (!%p136_p3, %s228_s13), 3  ;;  %v254_v7 = vmov 0.0  }
   0xc   : > { %244 = vset.pattern.permute.xlu0 %v253_v1  ;;  %s229_s14 = sshll.u32 %s294_s13, 3  ;;  %s231_s18 = sshll.u32 %s294_s13, 2 }
   0xd   : > { %152 = vperm.xlu0 %244, %v149_v0   ;;  %s139_s17 = scalar_lea.vmem %s290_s0, %s229_s14  ;;  %s145_s21 = scalar_lea.vmem %s292_s2, %s231_s18 }
   0xe   : > { %v147_v2 = vld [vmem:[%s139_s17] sm:$0xff]  ;;  %v148_v3 = vld [vmem:[%s139_s17 + $0x8] sm:$0xff] }
  0x7f   : > { %v153_v4 = vpop.permute.xlu0 %152 }
  0x80   : > { %v155_v5 = vadd.f32 %v153_v4, %v147_v2  ;;  %v156_v6 = vadd.f32 %v153_v4, %v148_v3 }
  0x82   : > { %vm157_vm0 = vcmp.gt.f32.partialorder %v155_v5, 0.0  ;;  %vm158_vm1 = vcmp.gt.f32.partialorder %v156_v6, 0.0  ;;  %vm159_vm2 = vcmp.lt.f32.partialorder %v155_v5, 0.0  ;;  %vm160_vm3 = vcmp.lt.f32.partialorder %v156_v6, 0.0 }
  0x83   : > { %v161_v8 = vsel %vm159_vm2, -1.0, %v254_v7  ;;  %v162_v9 = vsel %vm160_vm3, -1.0, %v254_v7 }
  0x84   : > { %v163_v10 = vsel %vm157_vm0, 1.0, %v161_v8  ;;  %v164_v11 = vsel %vm158_vm1, 1.0, %v162_v9 }
  0x85   : > { %v165_v12 = vpack.c.bf16 %v164_v11, %v163_v10 }
  0x87   : > { %166 = vst [vmem:[%s145_s21] sm:$0xff] %v165_v12 }
  0x88 PF: > { %s12_s9 = sadd.s32 1, %s251_s9  }
  0x89   : > { %p9_p4 = scmp.ge.s32.totalorder %s12_s9, 4  }
  0x8b   :  { %11 = sbr.rel (!%p9_p4) target bundleno = 1 (0x1), region = 58 }

// kernel: basic_block_forward.7
= control target key start
LH: loop header
LB: loop body
LE: loop exit
PB: predicated region body
PF: predicated region fallthrough
CT: control target
= control target key end

     0   :  { %s615_s30 = smov 0   ;;  %s660_s0 = inlined_call_operand.vmem [shape: bf16[8,8], index: 0, kind: input, shape index: {}]   ;;  %s661_s1 = inlined_call_operand.vmem [shape: bf16[8,512], index: 1, kind: input, shape index: {}]   ;;  %s662_s2 = inlined_call_operand.vmem [shape: f32[8,512], index: 2, kind: input, shape index: {}]   ;;  %s663_s3 = inlined_call_operand.vmem [shape: f32[8,1], index: 3, kind: input, shape index: {}]   ;;  %s664_s4 = inlined_call_operand.vmem [shape: f32[8,1], index: 4, kind: input, shape index: {}]   ;;  %s665_s5 = inlined_call_operand.vmem [shape: f32[8,1], index: 5, kind: input, shape index: {}]   ;;  %s666_s6 = inlined_call_operand.vmem [shape: f32[8,1], index: 6, kind: input, shape index: {}]   ;;  %s667_s7 = inlined_call_operand.vmem [shape: f32[8,1], index: 7, kind: input, shape index: {}]   ;;  %s668_s8 = inlined_call_operand.vmem [shape: f32[8,1], index: 8, kind: input, shape index: {}]   ;;  %s669_s9 = inlined_call_operand.vmem [shape: f32[8,512], index: 9, kind: output, shape index: {}]  }
   0x1 LB: > { %s529_s10 = sadd.s32 4294967295, %s562_s30   ;;  %p533_p0 = scmp.ge.s32.totalorder %s562_s30, 1  ;;  %s562_s30 = sphi %s615_s30, %s19_s30  }
   0x2   : > { %p299_p1 = scmp.lt.s32.totalorder %s562_s30, 3 }
   0x4   : > { %p300_p2 = pnand %p533_p0, %p299_p1 }
   0x5   : > { %s534_s13 = sshll.u32 (!%p300_p2), %s529_s10, 1 }
   0x6   : > { %303 = sbr.rel (%p300_p2) target bundleno = 166 (0xa6), region = 56  ;;  %p341_p3 = scmp.lt.s32.totalorder (!%p300_p2), %s534_s13, 3 }
   0xb   : > { %v403_v0 = vld [vmem:[%s663_s3] sm:$0xff]  ;;  %v564_v1 = vmov 0   ;;  %s671_s13 = smov (!%p341_p3, %s534_s13), 3  ;;  %vm370_vm0 = vcmask 1043456   ;;  %vm366_vm1 = vcmask 64512  }
   0xc   : > { %553 = vset.pattern.permute.xlu0 %v564_v1  ;;  %554 = vset.pattern.permute.xlu1 %v564_v1  ;;  %v419_v2 = vld [vmem:[%s665_s5] sm:$0xff]  ;;  %s535_s18 = sshll.u32 %s671_s13, 2  ;;  %s537_s10 = sshll.u32 %s671_s13, 3 }
   0xd   : > { %406 = vperm.xlu0 %553, %v403_v0   ;;  %422 = vperm.xlu1 %554, %v419_v2   ;;  %v441_v3 = vld [vmem:[%s667_s7] sm:$0xff]  ;;  %s344_s21 = scalar_lea.vmem %s661_s1, %s535_s18  ;;  %s350_s14 = scalar_lea.vmem %s662_s2, %s537_s10 }
   0xe   : > { %555 = vset.pattern.permute.xlu2 %v564_v1  ;;  %v360_v4 = vld [vmem:[%s344_s21] sm:$0xff]  ;;  %v428_v26 = vld [vmem:[%s350_s14 + $0x8] sm:$0xff]  ;;  %s356_s16 = scalar_lea.vmem %s669_s9, %s537_s10 }
   0xf   : > { %444 = vperm.xlu2 %555, %v441_v3   ;;  %v411_v5 = vld [vmem:[%s664_s4] sm:$0xff]  ;;  %v362_v7 = vunpack.c.l.b16 %v360_v4  ;;  %v363_v8 = vunpack.c.h.b16 %v360_v4 }
  0x10   : > { %v431_v6 = vld [vmem:[%s666_s6] sm:$0xff] }
  0x11   : > { %v451_v9 = vld [vmem:[%s668_s8] sm:$0xff]  ;;  %v364_v10 = vpack.c.b16 %v362_v7, %v362_v7  ;;  %v365_v11 = vpack.c.b16 %v363_v8, %v363_v8 }
  0x12   : > { %v359_v14 = vld [vmem:[%s660_s0] sm:$0xf] }
  0x13   : > { %v372_v12 = vsel %vm370_vm0, %v364_v10, 0  ;;  %v375_v13 = vsel %vm370_vm0, %v365_v11, 0  ;;  %v427_v25 = vld [vmem:[%s350_s14] sm:$0xff] }
  0x14   : > { %384 = vmatpush.bf16.msra.mxu0 %v372_v12  ;;  %397 = vmatpush.bf16.msra.mxu1 %v375_v13 }
  0x15   : > { %414 = vperm.xlu0 %553, %v411_v5   ;;  %434 = vperm.xlu1 %554, %v431_v6  }
  0x17   : > { %454 = vperm.xlu2 %555, %v451_v9   ;;  %540 = vmatmul.msk.bf16.vlgmr.msra.gmra.mxu0 %vm366_vm1, %v359_v14 }
  0x18   : > { %541 = vmatmul.msk.bf16.vlgmr.msra.gmra.mxu1 %vm366_vm1, %v359_v14 }
  0x69   : > { %v445_v22 = vpop.permute.xlu2 %444 }
  0x71   : > { %v455_v38 = vpop.permute.xlu2 %454 }
  0x7f   : > { %v407_v15 = vpop.permute.xlu0 %406  ;;  %v423_v16 = vpop.permute.xlu1 %422 }
  0x87   : > { %v415_v21 = vpop.permute.xlu0 %414  ;;  %v435_v29 = vpop.permute.xlu1 %434 }
  0x94   : > { %v386_v17 = vpop.f32.mrf.mxu0 }
  0x95   : > { %v399_v18 = vpop.f32.mrf.mxu1  ;;  %v409_v19 = vsub.f32 %v386_v17, %v407_v15 }
  0x96   : > { %v410_v20 = vsub.f32 %v399_v18, %v407_v15 }
  0x97   : > { %v417_v23 = vmul.f32 %v415_v21, %v409_v19 }
  0x98   : > { %v418_v24 = vmul.f32 %v415_v21, %v410_v20 }
  0x99   : > { %v425_v27 = vadd.f32 %v423_v16, %v417_v23 }
  0x9a   : > { %v426_v28 = vadd.f32 %v423_v16, %v418_v24 }
  0x9b   : > { %v429_v30 = vadd.f32 %v427_v25, %v425_v27 }
  0x9c   : > { %v430_v31 = vadd.f32 %v428_v26, %v426_v28  ;;  %v388_v32 = vpop.f32.mrf.mxu0 }
  0x9d   : > { %v401_v33 = vpop.f32.mrf.mxu1  ;;  %v437_v34 = vadd.f32 %v435_v29, %v429_v30 }
  0x9e   : > { %v438_v35 = vadd.f32 %v435_v29, %v430_v31 }
  0x9f   : > { %vm439_vm2 = vcmp.gt.f32.partialorder %v437_v34, 0.0  ;;  %v447_v36 = vmul.f32 %v445_v22, %v437_v34 }
  0xa0   : > { %vm440_vm3 = vcmp.gt.f32.partialorder %v438_v35, 0.0  ;;  %v448_v37 = vmul.f32 %v445_v22, %v438_v35 }
  0xa1   : > { %v449_v39 = vsel %vm439_vm2, %v437_v34, %v447_v36 }
  0xa2   : > { %v450_v40 = vsel %vm440_vm3, %v438_v35, %v448_v37  ;;  %v457_v41 = vadd.f32 %v455_v38, %v449_v39 }
  0xa3   : > { %v458_v42 = vadd.f32 %v455_v38, %v450_v40 }
  0xa4   : > { %459 = vst [vmem:[%s356_s16] sm:$0xff] %v457_v41 }
  0xa5   : > { %460 = vst [vmem:[%s356_s16 + $0x8] sm:$0xff] %v458_v42 }
  0xa6 PF: > { %s19_s30 = sadd.s32 1, %s562_s30  }
  0xa7   : > { %p16_p4 = scmp.ge.s32.totalorder %s19_s30, 4  }
  0xa9   :  { %18 = sbr.rel (!%p16_p4) target bundleno = 1 (0x1), region = 89 }

// kernel: basic_block_forward.5
= control target key start
LH: loop header
LB: loop body
LE: loop exit
PB: predicated region body
PF: predicated region fallthrough
CT: control target
= control target key end

     0   :  { %s811_s30 = smov 0   ;;  %s813_s10 = smov 0   ;;  %s909_s0 = inlined_call_operand.vmem [shape: bf16[8,72], index: 0, kind: input, shape index: {}]   ;;  %s910_s1 = inlined_call_operand.vmem [shape: bf16[72,512], index: 1, kind: input, shape index: {}]   ;;  %s911_s2 = inlined_call_operand.vmem [shape: f32[8,512], index: 2, kind: input, shape index: {}]   ;;  %s912_s3 = inlined_call_operand.vmem [shape: f32[8,1], index: 3, kind: input, shape index: {}]   ;;  %s913_s4 = inlined_call_operand.vmem [shape: f32[8,1], index: 4, kind: input, shape index: {}]   ;;  %s914_s5 = inlined_call_operand.vmem [shape: f32[8,1], index: 5, kind: input, shape index: {}]   ;;  %s915_s6 = inlined_call_operand.vmem [shape: f32[8,1], index: 6, kind: input, shape index: {}]   ;;  %s916_s7 = inlined_call_operand.vmem [shape: f32[8,1], index: 7, kind: input, shape index: {}]   ;;  %s917_s8 = inlined_call_operand.vmem [shape: f32[8,1], index: 8, kind: input, shape index: {}]   ;;  %s918_s9 = inlined_call_operand.vmem [shape: f32[8,512], index: 9, kind: output, shape index: {}]  }
   0x1   :  { %s815_s11 = smov 0  }
   0x2 LB: > { %s650_s12 = sadd.s32 4294967295, %s758_s11   ;;  %s828_s13 = sadd.s32 1, %s758_s11   ;;  %s758_s11 = sphi %s815_s11, %s921_s11   ;;  %s754_s10 = sphi %s813_s10, %s920_s10   ;;  %s750_s30 = sphi %s811_s30, %s919_s30  }
   0x3   : > { %s44_s14 = ssub.s32 %s758_s11, %s828_s13  ;;  %s47_s15 = sadd.s32 1, %s754_s10 }
   0x4   : > { %p45_p0 = scmp.eq.s32.totalorder %s44_s14, 0  ;;  %p54_p1 = scmp.ne.s32.totalorder %s754_s10, %s750_s30 }
   0x5   : > { %p55_p2 = scmp.eq.s32.totalorder %s758_s11, 0  ;;  %p653_p4 = scmp.ge.s32.totalorder %s758_s11, 2 }
   0x6   : > { %s837_s16 = scalar_select %p45_p0, %s754_s10, %s47_s15  }
   0x7   : > { %p56_p3 = por %p55_p2, %p54_p1  ;;  %279 = sbr.rel (%p653_p4) target bundleno = 25 (0x19), region = 44 }
   0xc   : > { %282 = sbr.rel (!%p56_p3) target bundleno = 25 (0x19), region = 48  ;;  %s284_s17 = sand.u32 (%p56_p3), 1, %s754_s10  }
   0xd   : > { %s697_s18 = sshll.u32 (%p56_p3), %s758_s11, 3  ;;  %s706_s19 = smul.u32 (%p56_p3), 72, %s284_s17 }
   0xe   : > { %s289_s22 = scalar_lea.vmem (%p56_p3), %s910_s1, %s697_s18 }
   0xf   : > { %v334_v0 = vld [vmem:[%s289_s22] sm:$0xff] (%p56_p3)  ;;  %v336_v1 = vld [vmem:[%s289_s22 + $0x10] sm:$0xff] (%p56_p3)  ;;  %s286_s23 = scalar_lea.vmem (%p56_p3), [#allocation2], %s706_s19 }
  0x10   : > { %v338_v2 = vld [vmem:[%s289_s22 + $0x20] sm:$0xff] (%p56_p3)  ;;  %335 = vst [vmem:[%s286_s23] sm:$0xff] (%p56_p3), %v334_v0  ;;  %v340_v3 = vld [vmem:[%s289_s22 + $0x30] sm:$0xff] (%p56_p3) }
  0x11   : > { %337 = vst [vmem:[%s286_s23 + $0x8] sm:$0xff] %v336_v1  ;;  %v342_v4 = vld [vmem:[%s289_s22 + $0x40] sm:$0xff]  ;;  %v344_v5 = vld [vmem:[%s289_s22 + $0x50] sm:$0xff] }
  0x12   : > { %339 = vst [vmem:[%s286_s23 + $0x10] sm:$0xff] %v338_v2  ;;  %v346_v6 = vld [vmem:[%s289_s22 + $0x60] sm:$0xff]  ;;  %v348_v7 = vld [vmem:[%s289_s22 + $0x70] sm:$0xff] }
  0x13   : > { %341 = vst [vmem:[%s286_s23 + $0x18] sm:$0xff] %v340_v3  ;;  %v350_v8 = vld [vmem:[%s289_s22 + $0x80] sm:$0xff] }
  0x14   : > { %343 = vst [vmem:[%s286_s23 + $0x20] sm:$0xff] %v342_v4 }
  0x15   : > { %345 = vst [vmem:[%s286_s23 + $0x28] sm:$0xff] %v344_v5 }
  0x16   : > { %347 = vst [vmem:[%s286_s23 + $0x30] sm:$0xff] %v346_v6 }
  0x17   : > { %349 = vst [vmem:[%s286_s23 + $0x38] sm:$0xff] %v348_v7 }
  0x18   : > { %351 = vst [vmem:[%s286_s23 + $0x40] sm:$0xff] %v350_v8 }
  0x19 PF: > { %p656_p5 = scmp.ge.s32.totalorder %s758_s11, 1  ;;  %p365_p6 = scmp.lt.s32.totalorder %s758_s11, 3 }
  0x1b   : > { %p366_p7 = pnand %p656_p5, %p365_p6 }
  0x1c   : > { %s372_s24 = sand.u32 (!%p366_p7), 1, %s750_s30   ;;  %s657_s25 = sshll.u32 (!%p366_p7), %s650_s12, 1 }
  0x1d   : > { %369 = sbr.rel (%p366_p7) target bundleno = 205 (0xcd), region = 90  ;;  %p414_p8 = scmp.lt.s32.totalorder (!%p366_p7), %s657_s25, 3 }
  0x1e   : > { %s707_s27 = smul.u32 (!%p366_p7), 72, %s372_s24 }
  0x20   : > { %s857_s30 = scalar_lea.vmem (!%p366_p7), [#allocation2], %s707_s27 }
  0x22   : > { %v518_v9 = vld [vmem:[%s912_s3] sm:$0xff]  ;;  %v760_v10 = vmov 0   ;;  %vm485_vm0 = vcmask 1043456   ;;  %v687_v16 = vld [vmem:[%s857_s30 + $0x30] sm:$0xf]  ;;  %vm481_vm1 = vcmask 588800  }
  0x23   : > { %733 = vset.pattern.permute.xlu0 %v760_v10  ;;  %734 = vset.pattern.permute.xlu1 %v760_v10  ;;  %v534_v11 = vld [vmem:[%s914_s5] sm:$0xff]  ;;  %v704_v20 = vld [vmem:[%s857_s30 + $0x34] sm:$0xf]  ;;  %v703_v30 = vld [vmem:[%s857_s30 + $0x24] sm:$0xf0]  ;;  %s923_s25 = smov (!%p414_p8, %s657_s25), 3 }
  0x24   : > { %521 = vperm.xlu0 %733, %v518_v9   ;;  %537 = vperm.xlu1 %734, %v534_v11   ;;  %v556_v12 = vld [vmem:[%s916_s7] sm:$0xff]  ;;  %v681_v32 = vld [vmem:[%s857_s30 + $0x28] sm:$0xf0]  ;;  %v671_v35 = vld [vmem:[%s857_s30 + $0x10] sm:$0xf]  ;;  %s658_s26 = sshll.u32 %s923_s25, 3 }
  0x25   : > { %735 = vset.pattern.permute.xlu2 %v760_v10  ;;  %v435_v13 = vld [vmem:[%s857_s30 + $0x40] sm:$0xff]  ;;  %v705_v19 = vld [vmem:[%s857_s30 + $0x34] sm:$0xf0]  ;;  %v689_v21 = vld [vmem:[%s857_s30 + $0x38] sm:$0xf0]  ;;  %s417_s29 = scalar_lea.vmem %s911_s2, %s658_s26  ;;  %s423_s14 = scalar_lea.vmem %s918_s9, %s658_s26 }
  0x26   : > { %559 = vperm.xlu2 %735, %v556_v12   ;;  %v461_v14 = vunpack.c.l.b16 %v435_v13  ;;  %v462_v15 = vunpack.c.h.b16 %v435_v13  ;;  %v526_v22 = vld [vmem:[%s913_s4] sm:$0xff]  ;;  %v688_v27 = vor.u32 %v705_v19, %v687_v16  ;;  %v692_v28 = vor.u32 %v704_v20, %v689_v21  ;;  %v700_v37 = vld [vmem:[%s857_s30 + $0x14] sm:$0xf]  ;;  %v699_v42 = vld [vmem:[%s857_s30 + $0x4] sm:$0xf0] }
  0x27   : > { %v546_v23 = vld [vmem:[%s915_s6] sm:$0xff]  ;;  %v665_v44 = vld [vmem:[%s857_s30 + $0x8] sm:$0xf0] }
  0x28   : > { %v471_v17 = vpack.c.b16 %v461_v14, %v461_v14  ;;  %v472_v18 = vpack.c.b16 %v462_v15, %v462_v15  ;;  %v566_v26 = vld [vmem:[%s917_s8] sm:$0xff]  ;;  %v543_v59 = vld [vmem:[%s417_s29 + $0x8] sm:$0xff] }
  0x29   : > { %v679_v29 = vld [vmem:[%s857_s30 + $0x20] sm:$0xf]  ;;  %v702_v31 = vld [vmem:[%s857_s30 + $0x24] sm:$0xf]  ;;  %v701_v36 = vld [vmem:[%s857_s30 + $0x14] sm:$0xf0] }
  0x2a   : > { %v487_v24 = vsel %vm485_vm0, %v471_v17, 0  ;;  %v490_v25 = vsel %vm485_vm0, %v472_v18, 0  ;;  %v680_v33 = vor.u32 %v703_v30, %v679_v29  ;;  %v684_v34 = vor.u32 %v702_v31, %v681_v32  ;;  %v673_v38 = vld [vmem:[%s857_s30 + $0x18] sm:$0xf0]  ;;  %v663_v41 = vld [vmem:[%s857_s30] sm:$0xf] }
  0x2b   : > { %495 = vmatpush.bf16.msra.mxu0 %v487_v24  ;;  %508 = vmatpush.bf16.msra.mxu1 %v490_v25  ;;  %v672_v39 = vor.u32 %v701_v36, %v671_v35  ;;  %v676_v40 = vor.u32 %v700_v37, %v673_v38  ;;  %v698_v43 = vld [vmem:[%s857_s30 + $0x4] sm:$0xf]  ;;  %v664_v45 = vor.u32 %v699_v42, %v663_v41  ;;  %v426_v47 = vld [vmem:[%s909_s0] sm:$0xf] }
  0x2c   : > { %529 = vperm.xlu0 %733, %v526_v22   ;;  %549 = vperm.xlu1 %734, %v546_v23   ;;  %v668_v46 = vor.u32 %v698_v43, %v665_v44  ;;  %v542_v58 = vld [vmem:[%s417_s29] sm:$0xff] }
  0x2e   : > { %569 = vperm.xlu2 %735, %v566_v26  }
  0x2f   : > { %496 = vmatpush.bf16.msra.mxu0 %v688_v27  ;;  %509 = vmatpush.bf16.msra.mxu1 %v692_v28 }
  0x33   : > { %497 = vmatpush.bf16.msra.mxu0 %v680_v33  ;;  %510 = vmatpush.bf16.msra.mxu1 %v684_v34 }
  0x37   : > { %498 = vmatpush.bf16.msra.mxu0 %v672_v39  ;;  %511 = vmatpush.bf16.msra.mxu1 %v676_v40 }
  0x3b   : > { %499 = vmatpush.bf16.msra.mxu0 %v664_v45  ;;  %512 = vmatpush.bf16.msra.mxu1 %v668_v46 }
  0x3e   : > { %693 = vmatmul.msk.bf16.vlgmr.msra.gmra.mxu0 %vm481_vm1, %v426_v47  ;;  %694 = vmatmul.msk.bf16.vlgmr.msra.gmra.mxu1 %vm481_vm1, %v426_v47 }
  0x80   : > { %v560_v55 = vpop.permute.xlu2 %559 }
  0x88   : > { %v570_v7 = vpop.permute.xlu2 %569 }
  0x96   : > { %v522_v48 = vpop.permute.xlu0 %521  ;;  %v538_v49 = vpop.permute.xlu1 %537 }
  0x9e   : > { %v530_v54 = vpop.permute.xlu0 %529  ;;  %v550_v62 = vpop.permute.xlu1 %549 }
  0xbb   : > { %v501_v50 = vpop.f32.mrf.mxu0  ;;  %v514_v51 = vpop.f32.mrf.mxu1 }
  0xbc   : > { %v524_v52 = vsub.f32 %v501_v50, %v522_v48  ;;  %v525_v53 = vsub.f32 %v514_v51, %v522_v48 }
  0xbe   : > { %v532_v56 = vmul.f32 %v530_v54, %v524_v52  ;;  %v533_v57 = vmul.f32 %v530_v54, %v525_v53 }
  0xc0   : > { %v540_v60 = vadd.f32 %v538_v49, %v532_v56  ;;  %v541_v61 = vadd.f32 %v538_v49, %v533_v57 }
  0xc2   : > { %v544_v63 = vadd.f32 %v542_v58, %v540_v60  ;;  %v545_v0 = vadd.f32 %v543_v59, %v541_v61 }
  0xc3   : > { %v503_v1 = vpop.f32.mrf.mxu0  ;;  %v516_v2 = vpop.f32.mrf.mxu1 }
  0xc4   : > { %v552_v3 = vadd.f32 %v550_v62, %v544_v63  ;;  %v553_v4 = vadd.f32 %v550_v62, %v545_v0 }
  0xc6   : > { %vm554_vm2 = vcmp.gt.f32.partialorder %v552_v3, 0.0  ;;  %vm555_vm3 = vcmp.gt.f32.partialorder %v553_v4, 0.0  ;;  %v562_v5 = vmul.f32 %v560_v55, %v552_v3  ;;  %v563_v6 = vmul.f32 %v560_v55, %v553_v4 }
  0xc8   : > { %v564_v8 = vsel %vm554_vm2, %v552_v3, %v562_v5  ;;  %v565_v9 = vsel %vm555_vm3, %v553_v4, %v563_v6 }
  0xc9   : > { %v572_v10 = vadd.f32 %v570_v7, %v564_v8  ;;  %v573_v11 = vadd.f32 %v570_v7, %v565_v9 }
  0xcb   : > { %574 = vst [vmem:[%s423_s14] sm:$0xff] %v572_v10 }
  0xcc   : > { %575 = vst [vmem:[%s423_s14 + $0x8] sm:$0xff] %v573_v11 }
  0xcd PF: > { %p16_p9 = scmp.ge.s32.totalorder %s828_s13, 4   ;;  %s919_s30 = smov %s754_s10 }
  0xce   : > { %s920_s10 = smov %s837_s16  ;;  %s921_s11 = smov %s828_s13 }
  0xcf   :  { %18 = sbr.rel (!%p16_p9) target bundleno = 2 (0x2), region = 132 }

</bundles_post_ra>
